<compile_context>
chip_gen: v7x
topology: tpu7x:2x2x1
jax: 0.10.0
libtpu: 0.0.40
codegen_flags: <defaults>
</compile_context>

<pallas_src>
import jax
import jax.numpy as jnp
from jax.experimental import pallas as pl
from jax.experimental.pallas import tpu as pltpu

_MIB = 1024 * 1024


def _l2_norm_kernel(x_ref, o_ref):
    x = x_ref[...]                                        # (TB, Dp) tile in VMEM
    xf = x.astype(jnp.float32)                            # f32 accumulation (bf16-safe)
    sq_sum = jnp.sum(xf * xf, axis=-1, keepdims=True)     # per-row sum of squares (XLU)
    # rsqrt -> EUP slot; normalization is a single VPU multiply per element.
    o_ref[...] = (xf * jax.lax.rsqrt(sq_sum)).astype(o_ref.dtype)   # no eps (matches CUDA ref)


def _vmem_capacity_bytes() -> int:
    """Physical VMEM per TensorCore; conservative (v7x) fallback if unavailable."""
    try:
        return int(pltpu.get_tpu_info().vmem_capacity_bytes)
    except Exception:
        return 64 * _MIB


def _pick_row_tile(B: int, D_pad: int, itemsize: int, vmem_capacity: int) -> int:
    """Row tile: byte-targeted, VMEM-budgeted, sublane-rounded, megacore-friendly."""
    sublane = max(8, 32 // itemsize)        # 8 f32 / 16 bf16 / 32 int8-fp8
    if B <= sublane:
        return B                            # tiny batch: one (full) block

    # Per-generation buffer budget; 4 buffers live at once (in x2 + out x2).
    if vmem_capacity >= 100 * _MIB:         # v5e / v6e: 128 MiB VMEM
        buffer_budget = 48 * _MIB
    else:                                   # v7x: 64 MiB VMEM
        buffer_budget = 24 * _MIB
    rows_by_vmem = max(sublane, buffer_budget // (4 * D_pad * itemsize))

    # Byte target per input block: ~2 MiB hits >=85% of HBM streaming roofline;
    # never drop below 512 rows unless VMEM forces it.
    rows_by_target = max(512, (2 * _MIB) // (D_pad * itemsize))

    tb = min(B, rows_by_target, rows_by_vmem)

    # Keep >= 2 (prefer >= 4) grid steps when B is big enough so the "parallel"
    # batch axis shards across both v7x TensorCores with balanced work.
    if B >= 4 * sublane:
        tb = min(tb, max(sublane, pl.cdiv(B, 4)))
    elif B >= 2 * sublane:
        tb = min(tb, max(sublane, pl.cdiv(B, 2)))

    # Round down to the dtype's sublane packing granularity.
    tb = max(sublane, (tb // sublane) * sublane)
    return min(tb, B)


def l2_normalize(x: jnp.ndarray) -> jnp.ndarray:
    """L2-normalize each row of a (B, D) array: out[b, :] = x[b, :] / ||x[b, :]||_2."""
    B, D = x.shape
    itemsize = jnp.dtype(x.dtype).itemsize

    # Lane-density guard: pad D to a multiple of 128 (zeros don't change the
    # sum of squares), slice back at the end. No-op when D is already dense.
    D_pad = ((D + 127) // 128) * 128
    x_in = x if D_pad == D else jnp.pad(x, ((0, 0), (0, D_pad - D)))

    vmem_capacity = _vmem_capacity_bytes()
    tb = _pick_row_tile(B, D_pad, itemsize, vmem_capacity)
    grid = (pl.cdiv(B, tb),)                # partial tail block is masked by Pallas

    # Scoped VMEM limit sized to the tile (4 buffers) with headroom, capped per chip.
    needed = 4 * tb * D_pad * itemsize
    vmem_ceiling = 96 * _MIB if vmem_capacity >= 100 * _MIB else 48 * _MIB
    vmem_limit = int(min(vmem_ceiling, max(16 * _MIB, 2 * needed)))

    out = pl.pallas_call(
        _l2_norm_kernel,
        out_shape=jax.ShapeDtypeStruct((B, D_pad), x.dtype),
        grid_spec=pltpu.PrefetchScalarGridSpec(
            num_scalar_prefetch=0,
            grid=grid,
            in_specs=[pl.BlockSpec((tb, D_pad), lambda i: (i, 0))],
            out_specs=pl.BlockSpec((tb, D_pad), lambda i: (i, 0)),
        ),
        compiler_params=pltpu.CompilerParams(
            dimension_semantics=("parallel",),
            vmem_limit_bytes=vmem_limit,
        ),
    )(x_in)

    return out if D_pad == D else out[:, :D]


if __name__ == "__main__":
    key = jax.random.PRNGKey(0)

    # Small demo shape consistent with the module's forward (batch, dim).
    B, D = 16, 256
    x = jax.random.normal(key, (B, D), dtype=jnp.float32)
    out = jax.block_until_ready(l2_normalize(x))
    ref = x / jnp.sqrt(jnp.sum(x * x, axis=1, keepdims=True))
    assert out.shape == x.shape and out.dtype == x.dtype
    assert jnp.allclose(out, ref, atol=1e-5, rtol=1e-5)

    # Multi-step tiled path with a masked tail block and a lane-sparse D
    # (exercises cdiv tail handling + D padding).
    B2, D2 = 100, 192
    x2 = jax.random.normal(jax.random.PRNGKey(1), (B2, D2), dtype=jnp.float32)
    out2 = jax.block_until_ready(l2_normalize(x2))
    ref2 = x2 / jnp.sqrt(jnp.sum(x2 * x2, axis=1, keepdims=True))
    assert jnp.allclose(out2, ref2, atol=1e-5, rtol=1e-5)

    # Larger batch -> several grid steps, lane-dense D.
    B3, D3 = 1024, 256
    x3 = jax.random.normal(jax.random.PRNGKey(2), (B3, D3), dtype=jnp.float32)
    out3 = jax.block_until_ready(l2_normalize(x3))
    ref3 = x3 / jnp.sqrt(jnp.sum(x3 * x3, axis=1, keepdims=True))
    assert jnp.allclose(out3, ref3, atol=1e-5, rtol=1e-5)

    print("KERNEL_OK")
</pallas_src>

<mosaic_0001>
module attributes {stable_mosaic.version = 11 : i64} {
  func.func @_l2_norm_kernel(%arg0: i32, %arg1: memref<8x256xf32, #tpu.memory_space<vmem>>, %arg2: memref<8x256xf32, #tpu.memory_space<vmem>>) attributes {dimension_semantics = [#tpu.dimension_semantics<parallel>], iteration_bounds = array<i64: 2>, scalar_prefetch = 0 : i64, scratch_operands = 0 : i64, tpu.core_type = #tpu.core_type<tc>, window_params = [{transform_indices = @transform_0, window_bounds = array<i64: 8, 256>}, {transform_indices = @transform_1, window_bounds = array<i64: 8, 256>}]} {
    %c0 = arith.constant 0 : index
    %c0_0 = arith.constant 0 : index
    %0 = vector.load %arg1[%c0, %c0_0] : memref<8x256xf32, #tpu.memory_space<vmem>>, vector<8x256xf32>
    %1 = arith.mulf %0, %0 : vector<8x256xf32>
    %cst = arith.constant dense<0.000000e+00> : vector<8xf32>
    %2 = vector.multi_reduction <add>, %1, %cst [1] : vector<8x256xf32> to vector<8xf32>
    %3 = vector.shape_cast %2 : vector<8xf32> to vector<8x1xf32>
    %4 = math.rsqrt %3 : vector<8x1xf32>
    %5 = vector.broadcast %4 : vector<8x1xf32> to vector<8x256xf32>
    %6 = arith.mulf %0, %5 : vector<8x256xf32>
    %c0_1 = arith.constant 0 : index
    %c0_2 = arith.constant 0 : index
    %7 = vector.load %arg2[%c0_1, %c0_2] : memref<8x256xf32, #tpu.memory_space<vmem>>, vector<8x256xf32>
    tpu.vector_store %arg2[%c0_1, %c0_2], %6 {strides = array<i32>} : memref<8x256xf32, #tpu.memory_space<vmem>>, vector<8x256xf32>,
    return
  }
  func.func @transform_0(%arg0: i32) -> (i32, i32) {
    %c0_i32 = arith.constant 0 : i32
    %c0_i32_0 = arith.constant 0 : i32
    return %arg0, %c0_i32 : i32, i32
  }
  func.func @transform_1(%arg0: i32) -> (i32, i32) {
    %c0_i32 = arith.constant 0 : i32
    %c0_i32_0 = arith.constant 0 : i32
    return %arg0, %c0_i32 : i32, i32
  }
}

</mosaic_0001>

<bundles_post_ra>
// kernel: tpu_custom_call.1
= control target key start
LH: loop header
LB: loop body
LE: loop exit
PB: predicated region body
PF: predicated region fallthrough
CT: control target
= control target key end

     0   :  { %6 = vsyncpa [#allocation3], 0  ;;  %s565_s0 = inlined_call_operand.hbm [shape: f32[16,256], index: 0, kind: input, shape index: {}]   ;;  %s566_s1 = inlined_call_operand.hbm [shape: f32[16,256], index: 1, kind: output, shape index: {}]  }
   0x1   :  { %8 = vsyncpa [#allocation3 + $0x1], 0 }
   0x2   :  { %9 = vsyncpa [#allocation4], 0 }
   0x3   :  { %11 = vsyncpa [#allocation4 + $0x1], 0  ;;  %s404_s6 = smov 0   ;;  %s406_s7 = smov 0  }
   0x4   :  { %s408_s8 = smov 0   ;;  %s410_s9 = smov 0  }
   0x5 LB: > { %s425_s10 = sadd.s32 4294967295, %s390_s9   ;;  %s230_s11 = sadd.s32 4294967294, %s390_s9   ;;  %s390_s9 = sphi %s410_s9, %s581_s9   ;;  %s386_s8 = sphi %s408_s8, %s580_s8   ;;  %s382_s7 = sphi %s406_s7, %s579_s7   ;;  %s378_s6 = sphi %s404_s6, %s578_s6  }
   0x6   : > { %s429_s12 = sadd.s32 1, %s390_s9   ;;  %s24_s13 = sadd.s32 1, %s386_s8 }
   0x7   : > { %s21_s14 = ssub.s32 %s390_s9, %s429_s12  ;;  %p31_p0 = scmp.ne.s32.totalorder %s386_s8, %s382_s7 }
   0x8   : > { %p22_p1 = scmp.eq.s32.totalorder %s21_s14, 0  ;;  %p32_p2 = scmp.eq.s32.totalorder %s390_s9, 0 }
   0x9   : > { %p37_p3 = scmp.ne.s32.totalorder %s382_s7, %s378_s6  ;;  %p38_p4 = scmp.eq.s32.totalorder %s425_s10, 0 }
   0xa   : > { %s441_s15 = scalar_select %p22_p1, %s386_s8, %s24_s13  }
   0xb   : > { %p443_p5 = por %p32_p2, %p31_p0  ;;  %p447_p6 = por %p38_p4, %p37_p3 }
   0xc   : > { %p61_p7 = scmp.eq.s32.totalorder %s425_s10, 1  ;;  %p67_p8 = scmp.eq.s32.totalorder %s230_s11, 1 }
   0xd   : > { %p258_p10 = scmp.lt.s32.totalorder %s390_s9, 2  ;;  %s87_s20 = sand.u32 1, %s386_s8  }
   0xe   : > { %p454_p11 = por %p61_p7, %p31_p0  ;;  %p458_p12 = por %p67_p8, %p37_p3 }
   0xf   : > { %s244_s21 = sshll.u32 %s390_s9, 8  ;;  %s233_s22 = sshll.u32 %s87_s20, 4 }
  0x10   : > { %s570_s18 = scalar_select %p454_p11, 1, 0 }
  0x11   : > { %s571_s19 = scalar_select %p458_p12, 1, 0 }
  0x12   : > { %s467_s25 = scalar_lea.hbm %s565_s0, %s244_s21  ;;  %s91_s26 = scalar_lea.vmem [#allocation2], %s233_s22 }
  0x13   : > { %s99_s27 = sshll.u32 %s91_s26, 4  ;;  %p471_p13 = pnand %p258_p10, %p443_p5  ;;  %s475_s27 = int_to_ptr.vmem [resolvable:$true] %s99_s27 }
  0x14   : > { %s88_s29 = scalar_lea.sflag [#allocation3], %s87_s20  ;;  %s294_s30 = scalar_lea.hbm %s467_s25, 256 }
  0x15   : > { %p295_p2 = scmp.ne.s32.totalorder %s467_s25, %s294_s30  ;;  %p296_p3 = pneg %p471_p13 }
  0x16   : > { %s299_s4 = scalar_lea.hbm %s565_s0, 512  ;;  %p300_p5 = scmp.lt.u32.totalorder %s467_s25, %s565_s0 }
  0x17   : > { %p297_p4 = pnand %p296_p3, %p295_p2  ;;  %p301_p8 = scmp.lt.u32.totalorder %s299_s4, %s294_s30 }
  0x18   : > { %p303_p9 = scmp.lt.u32.totalorder %s294_s30, %s467_s25 }
  0x19   : > { %p298_p7 = pneg %p297_p4  ;;  %p302_p10 = por %p301_p8, %p300_p5 }
  0x1b   : > { %p304_p0 = por %p303_p9, %p302_p10 }
  0x1d   : > { %p305_p1 = pnand %p304_p0, %p298_p7 }
  0x1f   : > { %308 = shalt.err (!%p305_p1)
}
  0x20   : > { %s309_s13 = scalar_lea.vmem %s475_s27, 256  ;;  %s392_s14 = smov [#allocation2]  }
  0x21   : > { %p310_p2 = scmp.ne.s32.totalorder %s475_s27, %s309_s13  ;;  %s314_s16 = sshll.u32 %s392_s14, 4  ;;  %s315_s16 = int_to_ptr.vmem [resolvable:$false] %s314_s16 }
  0x22   : > { %s316_s20 = scalar_lea.vmem %s315_s16, 512  ;;  %p317_p11 = scmp.lt.s32.totalorder %s475_s27, %s315_s16 }
  0x23   : > { %p312_p4 = pnand %p310_p2, %p296_p3  ;;  %p318_p5 = scmp.lt.s32.totalorder %s316_s20, %s309_s13 }
  0x25   : > { %p313_p12 = pneg %p312_p4  ;;  %p319_p8 = por %p318_p5, %p317_p11 }
  0x27   : > { %p320_p9 = pnand %p319_p8, %p313_p12 }
  0x29   : > { %323 = shalt.err (!%p320_p9)
}
  0x2a   : > { %253 = dma.hbm_to_vmem [thread:$0]  (!%p471_p13), %s467_s25, 256, %s475_s27, %s88_s29  }
  0x2b   : > { %p573_p0 = scmp.lt.s32.totalorder %s390_s9, 3  ;;  %p574_p1 = scmp.ge.s32.totalorder %s390_s9, 1 }
  0x2d   : > { %p105_p3 = pnand %p574_p1, %p573_p0 }
  0x2e   : > { %s509_s21 = sand.u32 (!%p105_p3), 1, %s382_s7  }
  0x2f   : > { %108 = sbr.rel (%p105_p3) target bundleno = 229 (0xe5), region = 24  ;;  %s237_s22 = sshll.u32 (!%p105_p3), %s509_s21, 4 }
  0x30   : > { %s111_s23 = scalar_lea.sflag (!%p105_p3), [#allocation3], %s509_s21  ;;  %s114_s24 = scalar_lea.vmem (!%p105_p3), [#allocation2], %s237_s22 }
  0x36   : > { %369 = dma.done.wait (%p447_p6), %s111_s23, 256  }
  0x37   : > { %371 = vsyncadd (%p447_p6), %s111_s23, 4294967040  ;;  %v133_v0 = vld [vmem:[%s114_s24] sm:$0xff]  ;;  %v134_v1 = vld [vmem:[%s114_s24 + $0x8] sm:$0xff]  ;;  %s245_s25 = sshll.u32 %s425_s10, 8  ;;  %s132_s26 = scalar_lea.vmem [#allocation5], %s237_s22 }
  0x38   : > { %v135_v2 = vmul.f32 %v133_v0, %v133_v0  ;;  %v136_v3 = vmul.f32 %v134_v1, %v134_v1  ;;  %s160_s27 = sshll.u32 %s132_s26, 4  ;;  %s521_s29 = scalar_lea.hbm %s566_s1, %s245_s25  ;;  %s523_s27 = int_to_ptr.vmem [resolvable:$true] %s160_s27 }
  0x39   : > { %s146_s30 = scalar_lea.sflag [#allocation4], %s509_s21  ;;  %s324_s2 = scalar_lea.vmem %s523_s27, 256 }
  0x3a   : > { %v137_v4 = vadd.f32 %v136_v3, %v135_v2  ;;  %p325_p6 = scmp.ne.s32.totalorder %s523_s27, %s324_s2  ;;  %p575_p11 = scmp.ne.s32.totalorder %s570_s18, 0 }
  0x3b   : > { %s393_s10 = smov [#allocation5]  }
  0x3c   : > { %138 = vadd.xlane.f32.xlu0 %v137_v4  ;;  %p326_p12 = pnand %p325_p6, %p575_p11  ;;  %s328_s3 = sshll.u32 %s393_s10, 4  ;;  %s329_s3 = int_to_ptr.vmem [resolvable:$false] %s328_s3 }
  0x3d   : > { %s330_s4 = scalar_lea.vmem %s329_s3, 512  ;;  %p331_p7 = scmp.lt.s32.totalorder %s523_s27, %s329_s3 }
  0x3e   : > { %p327_p13 = pneg %p326_p12  ;;  %p332_p10 = scmp.lt.s32.totalorder %s330_s4, %s324_s2 }
  0x40   : > { %p333_p2 = por %p332_p10, %p331_p7 }
  0x42   : > { %p334_p4 = pnand %p333_p2, %p327_p13 }
  0xc9   : > { %v139_v5 = vpop.xlane.xlu0 %138 }
  0xca   : > { %292 = vrsqrt.f32 %v139_v5 }
  0xd4   : > { %v293_v6 = vpop.eup %292 }
  0xd5   : > { %v141_v7 = vmul.f32 %v293_v6, %v133_v0  ;;  %v142_v8 = vmul.f32 %v293_v6, %v134_v1 }
  0xd7   : > { %143 = vst [vmem:[%s132_s26] sm:$0xff] %v141_v7  ;;  %144 = vst [vmem:[%s132_s26 + $0x8] sm:$0xff] %v142_v8 }
  0xd8   : > { %337 = shalt.err (!%p334_p4)
}
  0xd9   : > { %s338_s5 = scalar_lea.hbm %s521_s29, 256  ;;  %s342_s14 = scalar_lea.hbm %s566_s1, 512 }
  0xda   : > { %p339_p5 = scmp.ne.s32.totalorder %s521_s29, %s338_s5  ;;  %p343_p0 = scmp.lt.u32.totalorder %s521_s29, %s566_s1 }
  0xdb   : > { %p344_p1 = scmp.lt.u32.totalorder %s342_s14, %s338_s5  ;;  %p346_p6 = scmp.lt.u32.totalorder %s338_s5, %s521_s29 }
  0xdc   : > { %p340_p8 = pnand %p339_p5, %p575_p11 }
  0xdd   : > { %p345_p3 = por %p344_p1, %p343_p0 }
  0xde   : > { %p341_p9 = pneg %p340_p8 }
  0xdf   : > { %p347_p12 = por %p346_p6, %p345_p3 }
  0xe1   : > { %p348_p13 = pnand %p347_p12, %p341_p9 }
  0xe3   : > { %351 = shalt.err (!%p348_p13)
}
  0xe4   : > { %248 = dma.vmem_to_hbm [thread:$0]  (%p575_p11), %s523_s27, 256, %s521_s29, %s146_s30  }
  0xe5 PF: > { %s172_s21 = sand.u32 1, %s378_s6   ;;  %p576_p7 = scmp.ne.s32.totalorder %s571_s19, 0 }
  0xe6   : > { %p577_p10 = scmp.ge.s32.totalorder %s390_s9, 2  ;;  %s173_s22 = scalar_lea.sflag [#allocation4], %s172_s21 }
  0xe8   : > { %p255_p2 = pnand %p577_p10, %p576_p7 }
  0xea   : > { %373 = dma.done.wait (!%p255_p2), %s173_s22, 256  }
  0xeb   : > { %375 = vsyncadd (!%p255_p2), %s173_s22, 4294967040  ;;  %p14_p4 = scmp.ge.s32.totalorder %s429_s12, 4   ;;  %s578_s6 = smov %s382_s7 }
  0xec   : > { %s579_s7 = smov %s386_s8  ;;  %s580_s8 = smov %s441_s15 }
  0xed   : > { %s581_s9 = smov %s429_s12  ;;  %16 = sbr.rel (!%p14_p4) target bundleno = 5 (0x5), region = 69 }
  0xf4   :  { %178 = vsyncpa [#allocation3], 1 }
  0xf5   :  { %180 = vsyncpa [#allocation3 + $0x1], 1 }
  0xf6   :  { %181 = vsyncpa [#allocation4], 1 }
  0xf7   :  { %183 = vsyncpa [#allocation4 + $0x1], 1 }

</bundles_post_ra>
